<compile_context>
chip_gen: v7x
topology: tpu7x:2x2x1
jax: 0.10.0
libtpu: 0.0.40
codegen_flags: <defaults>
</compile_context>

<pallas_src>
import functools

import jax
import jax.numpy as jnp
from jax.experimental import pallas as pl
from jax.experimental.pallas import tpu as pltpu


def _round_up(x: int, m: int) -> int:
    return ((x + m - 1) // m) * m


def _pad_dim(n: int) -> int:
    # Lane-dense only when it pays: already-aligned or small dims use full-dim
    # blocks; otherwise round up to a multiple of 128.
    if n % 128 == 0 or n < 128:
        return n
    return _round_up(n, 128)


def prepare_params(weights, biases, *, use_bf16=True):
    """Pad / cast the per-camera parameters ONCE at init (outside the forward).

    weights: (C, input_size, output_size)  (PyTorch nn.Linear weight, transposed)
    biases:  (C, output_size)
    Returns (w_p, b_p): (C, Fp, Op) compute-dtype weights, (C, Op) f32 biases.
    """
    C, F, O = weights.shape
    Fp, Op = _pad_dim(F), _pad_dim(O)
    w = weights
    if (Fp, Op) != (F, O):
        w = jnp.zeros((C, Fp, Op), weights.dtype).at[:, :F, :O].set(weights)
    b = biases
    if Op != O:
        b = jnp.zeros((C, Op), biases.dtype).at[:, :O].set(biases)
    compute_dtype = jnp.bfloat16 if use_bf16 else jnp.float32
    return w.astype(compute_dtype), b.astype(jnp.float32)


def _grouped_linear_kernel(gid_ref, x_ref, w_ref, b_ref, o_ref):
    # gid_ref: (G,)    int32 SMEM  — scalar-prefetched per-tile camera id
    # x_ref:   (TM,Fp) bf16/f32    — one tile of samples (all from one camera)
    # w_ref:   (Fp,Op) bf16/f32    — selected camera's weight (leading dim squeezed)
    # b_ref:   (C, Op) f32         — all camera biases, resident in VMEM
    # o_ref:   (TM,Op) f32
    c = gid_ref[pl.program_id(0)]
    y = jnp.dot(x_ref[...], w_ref[...], preferred_element_type=jnp.float32)
    o_ref[...] = (y + b_ref[pl.ds(c, 1), :]).astype(o_ref.dtype)


@functools.partial(jax.jit, static_argnames=("out_size", "tm"))
def linear_classifier_forward(x, cam, w_p, b_p, *, out_size, tm=128):
    """x: (B, input_size) f32, cam: (B,) int32 in [0, C),
    w_p/b_p: output of prepare_params.  Returns (B, out_size) f32."""
    B, F = x.shape
    C, Fp, Op = w_p.shape
    compute_dtype = w_p.dtype

    # Adaptive batch tile: >=8, multiple of 8, capped at `tm` (128 default; use
    # tm=256 on v6e for large B to better fill the 256x256 MXU).
    TM = max(8, _round_up(min(tm, B), 8))
    # Worst-case tile count after per-camera padding (each camera group is padded
    # up to a multiple of TM): sum_c ceil(n_c/TM) <= ceil(B/TM) + C - 1.
    G = pl.cdiv(B, TM) + C - 1
    R = G * TM

    # ---- wrapper-side grouping (all dynamic values, static shapes) ----------
    # NOTE: cam values outside [0, C) are NOT checked (PyTorch would raise).
    cam = cam.astype(jnp.int32)
    counts = jnp.bincount(cam, length=C).astype(jnp.int32)       # samples / camera
    tiles = (counts + TM - 1) // TM                               # tiles / camera
    cum_tiles = jnp.cumsum(tiles)
    row_start = jnp.concatenate(
        [jnp.zeros((1,), jnp.int32), cum_tiles[:-1]]) * TM        # dest row / camera
    samp_start = jnp.concatenate(
        [jnp.zeros((1,), jnp.int32), jnp.cumsum(counts)[:-1]])    # sorted offset / camera

    order = jnp.argsort(cam, stable=True)                         # group samples by camera
    cam_sorted = cam[order]
    j = jnp.arange(B, dtype=jnp.int32)
    dest = row_start[cam_sorted] + (j - samp_start[cam_sorted])   # row in grouped layout

    # Per-tile camera id (dead tiles map to the last camera; their output is
    # never gathered back).
    gid = jnp.clip(
        jnp.searchsorted(cum_tiles, jnp.arange(G, dtype=jnp.int32), side="right"),
        0, C - 1).astype(jnp.int32)

    # Cast to the matmul dtype, pad features only if needed, scatter into the
    # camera-grouped layout (padding rows stay zero).
    x_c = x.astype(compute_dtype)
    if Fp != F:
        x_c = jnp.zeros((B, Fp), compute_dtype).at[:, :F].set(x_c)
    x_g = jnp.zeros((R, Fp), compute_dtype).at[dest].set(x_c[order])

    # VMEM budget: double-buffered x & weight tiles (+ bias + output), with slack.
    itemsize = w_p.dtype.itemsize
    vmem_need = (2 * TM * Fp * itemsize + 2 * Fp * Op * itemsize
                 + 2 * C * Op * 4 + 2 * TM * Op * 4)
    vmem_limit = int(min(100 * 2**20, max(32 * 2**20, 2 * vmem_need)))

    out_g = pl.pallas_call(
        _grouped_linear_kernel,
        out_shape=jax.ShapeDtypeStruct((R, Op), jnp.float32),
        grid_spec=pltpu.PrefetchScalarGridSpec(
            num_scalar_prefetch=1,                 # gid -> SMEM, fed to index_maps
            grid=(G,),
            in_specs=[
                # one batch tile of grouped samples
                pl.BlockSpec((TM, Fp), lambda g, gid_ref: (g, 0)),
                # the selected camera's weight: data-dependent block index,
                # leading camera dim squeezed out of the kernel view.  Pallas
                # skips the DMA when gid is unchanged between consecutive tiles.
                pl.BlockSpec((None, Fp, Op), lambda g, gid_ref: (gid_ref[g], 0, 0)),
                # all biases resident (tiny), constant index map
                pl.BlockSpec((C, Op), lambda g, gid_ref: (0, 0)),
            ],
            out_specs=pl.BlockSpec((TM, Op), lambda g, gid_ref: (g, 0)),
        ),
        compiler_params=pltpu.CompilerParams(
            dimension_semantics=("parallel",),     # independent tiles -> v7x megacore
            vmem_limit_bytes=vmem_limit,
        ),
    )(gid, x_g, w_p, b_p)

    # Gather back to the original sample order and drop lane padding.
    out = jnp.zeros((B, out_size), jnp.float32).at[order].set(
        out_g[dest, :out_size])
    return out


if __name__ == "__main__":
    # Small deterministic setup consistent with the module's __init__:
    #   num_cameras=3, input_size=32, output_size=8, batch=4
    num_cameras, input_size, output_size, batch = 3, 32, 8, 4

    key = jax.random.PRNGKey(0)
    kx, kw, kb, kc = jax.random.split(key, 4)

    x = jax.random.normal(kx, (batch, input_size), dtype=jnp.float32)
    weights = (jax.random.normal(
        kw, (num_cameras, input_size, output_size), dtype=jnp.float32) * 0.1)
    biases = (jax.random.normal(
        kb, (num_cameras, output_size), dtype=jnp.float32) * 0.1)
    cam = jax.random.randint(kc, (batch,), 0, num_cameras, dtype=jnp.int32)

    # Pad/cast params once (outside the hot forward), then run the kernel.
    w_p, b_p = prepare_params(weights, biases, use_bf16=True)
    out = linear_classifier_forward(x, cam, w_p, b_p, out_size=output_size)
    out = jax.block_until_ready(out)
    assert out.shape == (batch, output_size)

    # Reference 1: exact module semantics with bf16-rounded matmul operands
    # (what the kernel computes: bf16 x/W, f32 accumulate, f32 bias).
    xb = x.astype(jnp.bfloat16).astype(jnp.float32)
    wb = weights.astype(jnp.bfloat16).astype(jnp.float32)
    ref_bf16 = jnp.stack(
        [xb[i] @ wb[cam[i]] + biases[cam[i]] for i in range(batch)], axis=0)
    assert jnp.allclose(out, ref_bf16, atol=1e-3, rtol=1e-3), (out, ref_bf16)

    # Reference 2: full-f32 PyTorch semantics (loose tolerance for bf16 operands).
    ref_f32 = jnp.stack(
        [x[i] @ weights[cam[i]] + biases[cam[i]] for i in range(batch)], axis=0)
    assert jnp.allclose(out, ref_f32, atol=5e-2, rtol=5e-2), (out, ref_f32)

    print("KERNEL_OK")
</pallas_src>

<mosaic_0001>
module attributes {stable_mosaic.version = 11 : i64} {
  func.func @_grouped_linear_kernel(%arg0: i32, %arg1: memref<3xi32, #tpu.memory_space<smem>>, %arg2: memref<8x32xbf16, #tpu.memory_space<vmem>>, %arg3: memref<1x32x8xbf16, #tpu.memory_space<vmem>>, %arg4: memref<3x8xf32, #tpu.memory_space<vmem>>, %arg5: memref<8x8xf32, #tpu.memory_space<vmem>>) attributes {dimension_semantics = [#tpu.dimension_semantics<parallel>], iteration_bounds = array<i64: 3>, scalar_prefetch = 1 : i64, scratch_operands = 0 : i64, tpu.core_type = #tpu.core_type<tc>, window_params = [{transform_indices = @transform_0, window_bounds = array<i64: 8, 32>}, {transform_indices = @transform_1, window_bounds = array<i64: 1, 32, 8>}, {pipeline_mode = #tpu.pipeline_mode<synchronous>, transform_indices = @transform_2, window_bounds = array<i64: 3, 8>}, {transform_indices = @transform_3, window_bounds = array<i64: 8, 8>}]} {
    %0 = arith.index_cast %arg0 : i32 to index
    %1 = memref.load %arg1[%0] : memref<3xi32, #tpu.memory_space<smem>>
    %c0 = arith.constant 0 : index
    %c0_0 = arith.constant 0 : index
    %2 = vector.load %arg2[%c0, %c0_0] : memref<8x32xbf16, #tpu.memory_space<vmem>>, vector<8x32xbf16>
    %c0_1 = arith.constant 0 : index
    %c0_2 = arith.constant 0 : index
    %c0_3 = arith.constant 0 : index
    %3 = vector.load %arg3[%c0_1, %c0_2, %c0_3] : memref<1x32x8xbf16, #tpu.memory_space<vmem>>, vector<1x32x8xbf16>
    %4 = vector.shape_cast %3 : vector<1x32x8xbf16> to vector<32x8xbf16>
    %cst = arith.constant dense<0.000000e+00> : vector<8x8xf32>
    %5 = tpu.matmul %2, %4, %cst {dimension_numbers = #tpu.dot_dimension_numbers<[1], [0], [0], [1], [0, 0, 1, 1], [], []>} : vector<8x32xbf16>, vector<32x8xbf16>, vector<8x8xf32> -> vector<8x8xf32>
    %6 = arith.index_cast %1 : i32 to index
    %c0_4 = arith.constant 0 : index
    %7 = vector.load %arg4[%6, %c0_4] : memref<3x8xf32, #tpu.memory_space<vmem>>, vector<1x8xf32>
    %8 = vector.broadcast %7 : vector<1x8xf32> to vector<8x8xf32>
    %9 = arith.addf %5, %8 : vector<8x8xf32>
    %c0_5 = arith.constant 0 : index
    %c0_6 = arith.constant 0 : index
    %10 = vector.load %arg5[%c0_5, %c0_6] : memref<8x8xf32, #tpu.memory_space<vmem>>, vector<8x8xf32>
    tpu.vector_store %arg5[%c0_5, %c0_6], %9 {strides = array<i32>} : memref<8x8xf32, #tpu.memory_space<vmem>>, vector<8x8xf32>,
    return
  }
  func.func @transform_0(%arg0: i32, %arg1: memref<3xi32, #tpu.memory_space<smem>>) -> (i32, i32) {
    %c0_i32 = arith.constant 0 : i32
    %c0_i32_0 = arith.constant 0 : i32
    return %arg0, %c0_i32 : i32, i32
  }
  func.func @transform_1(%arg0: i32, %arg1: memref<3xi32, #tpu.memory_space<smem>>) -> (i32, i32, i32) {
    %0 = arith.index_cast %arg0 : i32 to index
    %1 = memref.load %arg1[%0] : memref<3xi32, #tpu.memory_space<smem>>
    %c0_i32 = arith.constant 0 : i32
    %c0_i32_0 = arith.constant 0 : i32
    %c0_i32_1 = arith.constant 0 : i32
    return %1, %c0_i32, %c0_i32_0 : i32, i32, i32
  }
  func.func @transform_2(%arg0: i32, %arg1: memref<3xi32, #tpu.memory_space<smem>>) -> (i32, i32) {
    %c0_i32 = arith.constant 0 : i32
    %c0_i32_0 = arith.constant 0 : i32
    %c0_i32_1 = arith.constant 0 : i32
    return %c0_i32, %c0_i32_0 : i32, i32
  }
  func.func @transform_3(%arg0: i32, %arg1: memref<3xi32, #tpu.memory_space<smem>>) -> (i32, i32) {
    %c0_i32 = arith.constant 0 : i32
    %c0_i32_0 = arith.constant 0 : i32
    return %arg0, %c0_i32 : i32, i32
  }
}

</mosaic_0001>

<bundles_post_ra>
// kernel: custom-call
= control target key start
LH: loop header
LB: loop body
LE: loop exit
PB: predicated region body
PF: predicated region fallthrough
CT: control target
= control target key end

     0   :  { %s6_s0 = inlined_call_operand.vmem [shape: u32[3], index: 0, kind: output, shape index: {}]  }

// kernel: linear_classifier_forward.1
= control target key start
LH: loop header
LB: loop body
LE: loop exit
PB: predicated region body
PF: predicated region fallthrough
CT: control target
= control target key end

     0   :  { %s453_s0 = inlined_call_operand.vmem [shape: s32[3], index: 0, kind: input, shape index: {}]   ;;  %s454_s1 = inlined_call_operand.vmem [shape: bf16[24,32], index: 1, kind: input, shape index: {}]   ;;  %s455_s2 = inlined_call_operand.vmem [shape: bf16[3,32,8], index: 2, kind: input, shape index: {}]   ;;  %s456_s3 = inlined_call_operand.vmem [shape: f32[3,8], index: 3, kind: input, shape index: {}]   ;;  %s457_s4 = inlined_call_operand.vmem [shape: f32[24,8], index: 4, kind: output, shape index: {}]  }
   0x1   :  { %s9_s17 = sshll.u32 %s453_s0, 4  ;;  %s10_s17 = int_to_ptr.vmem [resolvable:$true] %s9_s17 }
   0x2   :  { %s377_s18 = scalar_lea.vmem %s10_s17, 16  ;;  %p382_p1 = scmp.lt.s32.totalorder %s10_s17, %s10_s17 }
   0x3   :  { %p378_p0 = scmp.ne.s32.totalorder %s10_s17, %s377_s18  ;;  %p383_p2 = scmp.lt.s32.totalorder %s377_s18, %s377_s18 }
   0x5   :  { %p384_p3 = por %p383_p2, %p382_p1 }
   0x7   :  { %p385_p4 = pnand %p384_p3, %p378_p0 }
   0x9   :  { %388 = shalt.err (!%p385_p4)  }
   0xa   :  { %s399_s19 = smov [#allocation3]  }
   0xb   :  { %12 = dma.vmem_to_smem %s10_s17, 16, %s399_s19, [#allocation2] }
   0xc   :  { %393 = dma.done.wait [#allocation2], 16 }
   0xd   :  { %394 = vsyncadd [#allocation2], 4294967280 }
   0xe   :  { %14 = sfence }
   0xf   :  { %s430_s20 = smov 0  }
  0x10 LB: > { %s337_s0 = sadd.s32 4294967295, %s397_s20   ;;  %p341_p5 = scmp.ge.s32.totalorder %s397_s20, 1  ;;  %s397_s20 = sphi %s430_s20, %s20_s20  }
  0x11   : > { %p157_p6 = scmp.lt.s32.totalorder %s397_s20, 4 }
  0x13   : > { %p158_p7 = pnand %p341_p5, %p157_p6 }
  0x14   : > { %s189_s21 = sld [smem:[#allocation3 + %s337_s0]] (!%p158_p7)  ;;  %v400_v0 = vmov (!%p158_p7), 0.0   ;;  %vm401_vm0 = vmmov (!%p158_p7), 0   ;;  %p185_p8 = scmp.lt.s32.totalorder (!%p158_p7), %s337_s0, 2  ;;  %vm225_vm1 = vcmask (!%p158_p7), 261120   ;;  %vm269_vm2 = vcmask (!%p158_p7), 64512  }
  0x15   : > { %161 = sbr.rel (%p158_p7) target bundleno = 255 (0xff), region = 32  ;;  %356 = vmatprep.subr.bf16.mxu0 (!%p158_p7), %v400_v0  ;;  %360 = vmatprep.mubr.msk.bf16.mxu0 (!%p158_p7), %vm401_vm0, %v400_v0  ;;  %s201_s5 = sld [smem:[#allocation3 + %s337_s0]] (!%p158_p7) }
  0x1a   : > { %p190_p9 = scmp.lt.s32.totalorder (!%p158_p7), %s189_s21, 2 }
  0x1b   : > { %s207_s8 = scalar_lea.vmem (!%p158_p7), %s456_s3, %s201_s5 }
  0x1c   : > { %s186_s22 = scalar_select %p185_p8, %s337_s0, 2  ;;  %v346_v4 = vld [vmem:[%s207_s8] ss:$0 sm:$0xff] }
  0x1d   : > { %s459_s21 = smov (!%p190_p9, %s189_s21), 2 }
  0x1e   : > { %s352_s23 = sshll.u32 %s459_s21, 4  ;;  %s342_s27 = sshll.u32 %s186_s22, 2 }
  0x1f   : > { %s194_s26 = scalar_lea.vmem %s455_s2, %s352_s23  ;;  %s188_s30 = scalar_lea.vmem %s454_s1, %s342_s27 }
  0x20   : > { %v375_v1 = vld [vmem:[%s194_s26] sm:$0xff]   ;;  %v376_v2 = vld [vmem:[%s194_s26 + $0x8] sm:$0xff]   ;;  %s345_s9 = sshll.u32 %s186_s22, 3 }
  0x21   : > { %357 = vmatpush3.bf16.msra.mxu0 %v375_v1  ;;  %v202_v3 = vld [vmem:[%s188_s30] sm:$0xf]  ;;  %s199_s12 = scalar_lea.vmem %s457_s4, %s345_s9 }
  0x22   : > { %358 = vmatprep.subr.bf16.mxu0 %v400_v0 }
  0x25   : > { %359 = vmatpush3.bf16.msra.mxu0 %v376_v2 }
  0x28   : > { %361 = vmatmul.mubr.msk.bf16.vlgmr.msra.gmra.mrb[0].mxu0 %vm225_vm1, %v202_v3 }
  0xfb   : > { %v263_v5 = vpop.f32.mrb[0].mxu0 }
  0xfc   : > { %v264_v6 = vadd.f32 %v346_v4, %v263_v5  ;;  %v362_v7 = vpop.f32.mrb[1].mxu0 }
  0xfd   : > { %v266_v8 = vpop.f32.mrb[2].mxu0 }
  0xfe   : > { %270 = vst.msk [vmem:[%s199_s12] sm:$0xff] %vm269_vm2, %v264_v6  ;;  %v363_v9 = vpop.f32.mrb[3].mxu0 }
  0xff PF: > { %s20_s20 = sadd.s32 1, %s397_s20  }
 0x100   : > { %p17_p10 = scmp.ge.s32.totalorder %s20_s20, 5  }
 0x102   :  { %19 = sbr.rel (!%p17_p10) target bundleno = 16 (0x10), region = 66 }

</bundles_post_ra>
